<compile_context>
chip_gen: v5e
topology: v5e:2x2
jax: 0.10.0
libtpu: 0.0.40
codegen_flags: <defaults>
</compile_context>

<pallas_src>
import functools

import jax
import jax.numpy as jnp
from jax.experimental import pallas as pl
from jax.experimental.pallas import tpu as pltpu

LANE = 128          # f32 lane width of a vreg
SUBLANE_F32 = 8     # f32 sublanes per vreg
SUBLANE_BF16 = 16   # bf16 packs 16 sublanes per vreg


def _round_up(x, m):
    return ((x + m - 1) // m) * m


def _discriminator_kernel(x_ref, w1_ref, b1_ref, w2_ref, b2_ref, o_ref, *,
                          valid_classes, mxu_dtype):
    # x arrives as raw f32 (no wrapper pad/cast HBM pass); cast to bf16 for the MXU here.
    x = x_ref[...].astype(mxu_dtype)

    # fc1: bf16 operands on the MXU, f32 accumulation; bias + ReLU stay f32 (v5e-safe VPU).
    h = jnp.dot(x, w1_ref[...], preferred_element_type=jnp.float32)
    h = jnp.maximum(h + b1_ref[...], 0.0)

    # fc2: cast the activation back to bf16 for full-rate MXU, keep f32 accumulation.
    logits = jnp.dot(h.astype(mxu_dtype), w2_ref[...], preferred_element_type=jnp.float32)
    logits = logits + b2_ref[...]

    # Mask the zero-padded class lanes so they do not perturb the softmax normalization.
    if valid_classes < logits.shape[-1]:
        lane = jax.lax.broadcasted_iota(jnp.int32, logits.shape, 1)
        logits = jnp.where(lane < valid_classes, logits, -1e30)

    # Numerically-stable log_softmax along the class (lane) axis, all in f32.
    m = jnp.max(logits, axis=-1, keepdims=True)
    shifted = logits - m
    lse = jnp.log(jnp.sum(jnp.exp(shifted), axis=-1, keepdims=True))
    o_ref[...] = (shifted - lse).astype(o_ref.dtype)


def prepare_params(w1, b1, w2, b2, *, mxu_dtype=jnp.bfloat16):
    """One-time (per parameter update) lane-padding + bf16 cast of the weights.

    w1: (K, H); b1: (H,) or (1, H); w2: (H, C); b2: (C,) or (1, C).
    Only the lane-facing dims H and C are padded to multiples of 128; K stays unpadded
    (the MXU handles non-128 reduction extents, and x is passed unpadded).
    """
    K, H = w1.shape
    C = w2.shape[1]
    Hp = _round_up(H, LANE)
    Cp = _round_up(C, LANE)
    w1p = jnp.zeros((K, Hp), mxu_dtype).at[:, :H].set(w1.astype(mxu_dtype))
    w2p = jnp.zeros((Hp, Cp), mxu_dtype).at[:H, :C].set(w2.astype(mxu_dtype))
    b1p = jnp.zeros((1, Hp), jnp.float32).at[:, :H].set(b1.reshape(1, H).astype(jnp.float32))
    b2p = jnp.zeros((1, Cp), jnp.float32).at[:, :C].set(b2.reshape(1, C).astype(jnp.float32))
    return {"w1": w1p, "b1": b1p, "w2": w2p, "b2": b2p, "num_classes": C}


def _vmem_bytes(tb, K, Hp, Cp, op_bytes):
    x_bytes = 2 * tb * K * 4                      # double-buffered f32 input tile
    out_bytes = 2 * tb * Cp * 4                   # double-buffered output tile
    w_bytes = (K * Hp + Hp * Cp) * op_bytes       # single-copy VMEM-pinned weights
    b_bytes = (Hp + Cp) * 4                       # VMEM-pinned f32 biases
    tmp_bytes = tb * Hp * (4 + op_bytes) + tb * Cp * 4   # h (f32 + bf16 cast) + logits
    return x_bytes + out_bytes + w_bytes + b_bytes + tmp_bytes


def _pick_batch_tile(B, block_b, K, Hp, Cp, op_bytes):
    if B <= SUBLANE_F32:
        return B  # block equal to the full batch dim is always legal
    align = SUBLANE_BF16 if B >= SUBLANE_BF16 else SUBLANE_F32
    tb = min(_round_up(block_b, align), _round_up(B, align))
    # v7x megacore: guarantee >= 2 batch tiles when the batch allows it, so
    # dimension_semantics=("parallel",) shards across both TensorCores.
    if pl.cdiv(B, tb) < 2 and B >= 2 * align:
        tb = _round_up(pl.cdiv(B, 2), align)
    # VMEM-fit guard (v7x: 64 MiB physical, 32 MiB default scoped): shrink TB if needed.
    budget = 48 << 20
    while tb > align and _vmem_bytes(tb, K, Hp, Cp, op_bytes) > budget:
        tb = max(align, _round_up(tb // 2, align))
    # TODO(synk): add an Hp-tiled (reduction-axis grid + f32 accumulator) fallback for
    # weight sets whose resident footprint exceeds v7x's 64 MiB VMEM even at minimal TB.
    return tb


def discriminator_forward(x, params, *, block_b=512, out_dtype=jnp.float32):
    """x: (B, K) float32; params: output of prepare_params(). Returns (B, C) out_dtype."""
    B, K = x.shape
    w1p, b1p, w2p, b2p = params["w1"], params["b1"], params["w2"], params["b2"]
    C = params["num_classes"]
    Hp = w1p.shape[1]
    Cp = w2p.shape[1]
    op_bytes = jnp.dtype(w1p.dtype).itemsize

    TB = _pick_batch_tile(B, block_b, K, Hp, Cp, op_bytes)
    grid = (pl.cdiv(B, TB),)

    # Explicit scoped-VMEM limit: measured footprint + 40% + 2 MiB headroom, capped at
    # v7x's 64 MiB physical capacity.
    vmem_limit = int(min(max(int(1.4 * _vmem_bytes(TB, K, Hp, Cp, op_bytes)) + (2 << 20),
                             8 << 20), 64 << 20))

    flops = 2 * B * (K * Hp + Hp * Cp)
    bytes_accessed = (B * K * 4
                      + (K * Hp + Hp * Cp) * op_bytes
                      + (Hp + Cp) * 4
                      + B * Cp * jnp.dtype(out_dtype).itemsize)

    kernel = functools.partial(_discriminator_kernel,
                               valid_classes=C, mxu_dtype=w1p.dtype)

    out = pl.pallas_call(
        kernel,
        out_shape=jax.ShapeDtypeStruct((B, Cp), out_dtype),
        grid=grid,
        in_specs=[
            # x: one (TB, K) raw-f32 batch tile per grid step (auto double-buffered).
            # Full-extent K is legal even when K is not a multiple of 128.
            pl.BlockSpec((TB, K), lambda i: (i, 0)),
            # Weights & biases: pinned whole in VMEM -> single copy, no per-step
            # re-blocking and no wasted double-buffer.
            pl.BlockSpec(memory_space=pltpu.MemorySpace.VMEM),   # w1 (K, Hp) bf16
            pl.BlockSpec(memory_space=pltpu.MemorySpace.VMEM),   # b1 (1, Hp) f32
            pl.BlockSpec(memory_space=pltpu.MemorySpace.VMEM),   # w2 (Hp, Cp) bf16
            pl.BlockSpec(memory_space=pltpu.MemorySpace.VMEM),   # b2 (1, Cp) f32
        ],
        # Lane-dense (TB, Cp) output tile -> unmasked vector stores.
        out_specs=pl.BlockSpec((TB, Cp), lambda i: (i, 0)),
        compiler_params=pltpu.CompilerParams(
            dimension_semantics=("parallel",),
            vmem_limit_bytes=vmem_limit,
        ),
        cost_estimate=pl.CostEstimate(
            flops=flops,
            transcendentals=B * Cp + B,     # exp per logit + log per row
            bytes_accessed=bytes_accessed,
        ),
    )(x, w1p, b1p, w2p, b2p)

    # Slice the padded class lanes back off (padded batch rows never exist: grid=cdiv(B,TB)).
    return out[:, :C]


def init_linear_params(key, in_features, out_features):
    # Deterministic PyTorch-style init: U(-1/sqrt(fan_in), 1/sqrt(fan_in)).
    kw, kb = jax.random.split(key)
    bound = 1.0 / jnp.sqrt(jnp.float32(in_features))
    w = jax.random.uniform(kw, (in_features, out_features), jnp.float32, -bound, bound)
    b = jax.random.uniform(kb, (1, out_features), jnp.float32, -bound, bound)
    return w, b


if __name__ == "__main__":
    # Small shapes consistent with the module's forward: x is (batch, input_size).
    batch, input_size, hidden_size, num_classes = 8, 32, 64, 16

    key = jax.random.PRNGKey(0)
    kx, k1, k2 = jax.random.split(key, 3)

    x = jax.random.normal(kx, (batch, input_size), jnp.float32)
    w1, b1 = init_linear_params(k1, input_size, hidden_size)
    w2, b2 = init_linear_params(k2, hidden_size, num_classes)

    params = prepare_params(w1, b1, w2, b2)
    out = jax.block_until_ready(discriminator_forward(x, params))
    assert out.shape == (batch, num_classes)

    # Reference along the same bf16-operand / f32-accumulate matmul path (tight tolerance).
    bf = jnp.bfloat16
    h_ref = jnp.maximum(
        jnp.dot(x.astype(bf), w1.astype(bf), preferred_element_type=jnp.float32) + b1, 0.0)
    logits_ref = jnp.dot(h_ref.astype(bf), w2.astype(bf),
                         preferred_element_type=jnp.float32) + b2
    ref = jax.nn.log_softmax(logits_ref, axis=1)
    assert jnp.allclose(out, ref, atol=1e-3, rtol=1e-3), float(jnp.max(jnp.abs(out - ref)))

    # Sanity check against pure-f32 PyTorch-equivalent math (loose: bf16 MXU operands).
    ref_f32 = jax.nn.log_softmax(jnp.maximum(x @ w1 + b1, 0.0) @ w2 + b2, axis=1)
    assert jnp.allclose(out, ref_f32, atol=5e-2, rtol=5e-2)

    print("KERNEL_OK")
</pallas_src>

<mosaic_0001>
module attributes {stable_mosaic.version = 11 : i64} {
  func.func @_discriminator_kernel(%arg0: i32, %arg1: memref<8x32xf32, #tpu.memory_space<vmem>>, %arg2: memref<32x128xbf16, #tpu.memory_space<vmem>>, %arg3: memref<1x128xf32, #tpu.memory_space<vmem>>, %arg4: memref<128x128xbf16, #tpu.memory_space<vmem>>, %arg5: memref<1x128xf32, #tpu.memory_space<vmem>>, %arg6: memref<8x128xf32, #tpu.memory_space<vmem>>) attributes {dimension_semantics = [#tpu.dimension_semantics<parallel>], iteration_bounds = array<i64: 1>, scalar_prefetch = 0 : i64, scratch_operands = 0 : i64, tpu.core_type = #tpu.core_type<tc>, window_params = [{transform_indices = @transform_0, window_bounds = array<i64: 8, 32>}, {pipeline_mode = #tpu.pipeline_mode<synchronous>, transform_indices = @transform_1, window_bounds = array<i64: 32, 128>}, {pipeline_mode = #tpu.pipeline_mode<synchronous>, transform_indices = @transform_2, window_bounds = array<i64: 1, 128>}, {pipeline_mode = #tpu.pipeline_mode<synchronous>, transform_indices = @transform_3, window_bounds = array<i64: 128, 128>}, {pipeline_mode = #tpu.pipeline_mode<synchronous>, transform_indices = @transform_4, window_bounds = array<i64: 1, 128>}, {transform_indices = @transform_5, window_bounds = array<i64: 8, 128>}]} {
    %c0 = arith.constant 0 : index
    %c0_0 = arith.constant 0 : index
    %0 = vector.load %arg1[%c0, %c0_0] : memref<8x32xf32, #tpu.memory_space<vmem>>, vector<8x32xf32>
    %1 = arith.truncf %0 : vector<8x32xf32> to vector<8x32xbf16>
    %c0_1 = arith.constant 0 : index
    %c0_2 = arith.constant 0 : index
    %2 = vector.load %arg2[%c0_1, %c0_2] : memref<32x128xbf16, #tpu.memory_space<vmem>>, vector<32x128xbf16>
    %cst = arith.constant dense<0.000000e+00> : vector<8x128xf32>
    %3 = tpu.matmul %1, %2, %cst {dimension_numbers = #tpu.dot_dimension_numbers<[1], [0], [0], [1], [0, 0, 1, 1], [], []>} : vector<8x32xbf16>, vector<32x128xbf16>, vector<8x128xf32> -> vector<8x128xf32>
    %c0_3 = arith.constant 0 : index
    %c0_4 = arith.constant 0 : index
    %4 = vector.load %arg3[%c0_3, %c0_4] : memref<1x128xf32, #tpu.memory_space<vmem>>, vector<1x128xf32>
    %5 = vector.broadcast %4 : vector<1x128xf32> to vector<8x128xf32>
    %6 = arith.addf %3, %5 : vector<8x128xf32>
    %cst_5 = arith.constant 0.000000e+00 : f32
    %7 = vector.broadcast %cst_5 : f32 to vector<8x128xf32>
    %8 = arith.maximumf %6, %7 : vector<8x128xf32>
    %9 = arith.truncf %8 : vector<8x128xf32> to vector<8x128xbf16>
    %c0_6 = arith.constant 0 : index
    %c0_7 = arith.constant 0 : index
    %10 = vector.load %arg4[%c0_6, %c0_7] : memref<128x128xbf16, #tpu.memory_space<vmem>>, vector<128x128xbf16>
    %cst_8 = arith.constant dense<0.000000e+00> : vector<8x128xf32>
    %11 = tpu.matmul %9, %10, %cst_8 {dimension_numbers = #tpu.dot_dimension_numbers<[1], [0], [0], [1], [0, 0, 1, 1], [], []>} : vector<8x128xbf16>, vector<128x128xbf16>, vector<8x128xf32> -> vector<8x128xf32>
    %c0_9 = arith.constant 0 : index
    %c0_10 = arith.constant 0 : index
    %12 = vector.load %arg5[%c0_9, %c0_10] : memref<1x128xf32, #tpu.memory_space<vmem>>, vector<1x128xf32>
    %13 = vector.broadcast %12 : vector<1x128xf32> to vector<8x128xf32>
    %14 = arith.addf %11, %13 : vector<8x128xf32>
    %15 = tpu.iota {dimensions = array<i32: 1>} : vector<8x128xi32>
    %c16_i32 = arith.constant 16 : i32
    %16 = vector.broadcast %c16_i32 : i32 to vector<8x128xi32>
    %17 = arith.cmpi slt, %15, %16 : vector<8x128xi32>
    %cst_11 = arith.constant -1.000000e+30 : f32
    %18 = vector.broadcast %cst_11 : f32 to vector<8x128xf32>
    %19 = arith.select %17, %14, %18 : vector<8x128xi1>, vector<8x128xf32>
    %cst_12 = arith.constant dense<0xFF800000> : vector<8xf32>
    %20 = vector.multi_reduction <maximumf>, %19, %cst_12 [1] : vector<8x128xf32> to vector<8xf32>
    %21 = vector.shape_cast %20 : vector<8xf32> to vector<8x1xf32>
    %22 = vector.broadcast %21 : vector<8x1xf32> to vector<8x128xf32>
    %23 = arith.subf %19, %22 : vector<8x128xf32>
    %24 = math.exp %23 : vector<8x128xf32>
    %cst_13 = arith.constant dense<0.000000e+00> : vector<8xf32>
    %25 = vector.multi_reduction <add>, %24, %cst_13 [1] : vector<8x128xf32> to vector<8xf32>
    %26 = vector.shape_cast %25 : vector<8xf32> to vector<8x1xf32>
    %27 = math.log %26 : vector<8x1xf32>
    %28 = vector.broadcast %27 : vector<8x1xf32> to vector<8x128xf32>
    %29 = arith.subf %23, %28 : vector<8x128xf32>
    %c0_14 = arith.constant 0 : index
    %c0_15 = arith.constant 0 : index
    %30 = vector.load %arg6[%c0_14, %c0_15] : memref<8x128xf32, #tpu.memory_space<vmem>>, vector<8x128xf32>
    tpu.vector_store %arg6[%c0_14, %c0_15], %29 {strides = array<i32>} : memref<8x128xf32, #tpu.memory_space<vmem>>, vector<8x128xf32>,
    return
  }
  func.func @transform_0(%arg0: i32) -> (i32, i32) {
    %c0_i32 = arith.constant 0 : i32
    %c0_i32_0 = arith.constant 0 : i32
    return %arg0, %c0_i32 : i32, i32
  }
  func.func @transform_1(%arg0: i32) -> (i32, i32) {
    %c0_i32 = arith.constant 0 : i32
    %c0_i32_0 = arith.constant 0 : i32
    %c0_i32_1 = arith.constant 0 : i32
    return %c0_i32, %c0_i32_0 : i32, i32
  }
  func.func @transform_2(%arg0: i32) -> (i32, i32) {
    %c0_i32 = arith.constant 0 : i32
    %c0_i32_0 = arith.constant 0 : i32
    %c0_i32_1 = arith.constant 0 : i32
    return %c0_i32, %c0_i32_0 : i32, i32
  }
  func.func @transform_3(%arg0: i32) -> (i32, i32) {
    %c0_i32 = arith.constant 0 : i32
    %c0_i32_0 = arith.constant 0 : i32
    %c0_i32_1 = arith.constant 0 : i32
    return %c0_i32, %c0_i32_0 : i32, i32
  }
  func.func @transform_4(%arg0: i32) -> (i32, i32) {
    %c0_i32 = arith.constant 0 : i32
    %c0_i32_0 = arith.constant 0 : i32
    %c0_i32_1 = arith.constant 0 : i32
    return %c0_i32, %c0_i32_0 : i32, i32
  }
  func.func @transform_5(%arg0: i32) -> (i32, i32) {
    %c0_i32 = arith.constant 0 : i32
    %c0_i32_0 = arith.constant 0 : i32
    return %arg0, %c0_i32 : i32, i32
  }
}

</mosaic_0001>

<bundles_post_ra>
// kernel: tpu_custom_call.1
= control target key start
LH: loop header
LB: loop body
LE: loop exit
PB: predicated region body
PF: predicated region fallthrough
CT: control target
= control target key end

     0   :  { %10 = vsyncpa [#allocation3], 0  ;;  %s441_s0 = inlined_call_operand.hbm [shape: f32[8,32], index: 0, kind: input, shape index: {}]   ;;  %s442_s1 = inlined_call_operand.hbm [shape: bf16[32,128], index: 1, kind: input, shape index: {}]   ;;  %s443_s2 = inlined_call_operand.vmem [shape: f32[1,128], index: 2, kind: input, shape index: {}]   ;;  %s444_s3 = inlined_call_operand.hbm [shape: bf16[128,128], index: 3, kind: input, shape index: {}]   ;;  %s445_s4 = inlined_call_operand.vmem [shape: f32[1,128], index: 4, kind: input, shape index: {}]   ;;  %s446_s5 = inlined_call_operand.hbm [shape: f32[8,128], index: 5, kind: output, shape index: {}]  }
   0x1   :  { %11 = vsyncpa [#allocation6], 0  ;;  %s28_s20 = sshll.u32 %s442_s1, 4  ;;  %s29_s20 = int_to_ptr.hbm [resolvable:$true] %s28_s20 }
   0x2   :  { %12 = vsyncpa [#allocation4], 0  ;;  %s387_s21 = smov [#allocation5]   ;;  %s18_s25 = sshll.u32 %s441_s0, 4  ;;  %s19_s25 = int_to_ptr.hbm [resolvable:$true] %s18_s25 }
   0x3   :  { %s30_s22 = sshll.u32 %s387_s21, 4  ;;  %s388_s26 = smov 64   ;;  %s31_s22 = int_to_ptr.vmem [resolvable:$true] %s30_s22 }
   0x4   :  { %s389_s27 = smov 4   ;;  %s390_s28 = smov [#allocation2]  }
   0x5   :  { %36 = dma.hbm_to_vmem [thread:$0]  %s29_s20, 256, %s31_s22, [#allocation6], %s388_s26, %s388_s26, %s389_s27  }
   0x6   :  { %s20_s29 = sshll.u32 %s390_s28, 4  ;;  %s43_s7 = sshll.u32 %s444_s3, 4  ;;  %s21_s29 = int_to_ptr.vmem [resolvable:$true] %s20_s29  ;;  %s44_s7 = int_to_ptr.hbm [resolvable:$true] %s43_s7 }
   0x7   :  { %23 = dma.hbm_to_vmem [thread:$0]  %s19_s25, 128, %s21_s29, [#allocation3]  }
   0x8   :  { %s391_s1 = smov [#allocation7]  }
   0x9   :  { %s45_s8 = sshll.u32 %s391_s1, 4  ;;  %s46_s8 = int_to_ptr.vmem [resolvable:$true] %s45_s8 }
   0xa   :  { %51 = dma.hbm_to_vmem [thread:$0]  %s44_s7, 1024, %s46_s8, [#allocation6], %s388_s26, %s388_s26, %s389_s27  }
   0xb   :  { %381 = dma.done.wait [#allocation3], 128  }
   0xc   :  { %382 = vsyncadd [#allocation3], 4294967168 }
   0xd   :  { %383 = dma.done.wait [#allocation6], 1280  }
   0xe   :  { %384 = vsyncadd [#allocation6], 4294966016  ;;  %v264_v0 = vld [vmem:[#allocation5 + $0x8] sm:$0xff]  ;;  %v263_v2 = vld [vmem:[#allocation5] sm:$0xff]  ;;  %vm89_vm0 = vcmask 261120   ;;  %v189_v18 = vlaneseq }
   0xf   :  { %v272_v1 = vld [vmem:[#allocation7 + $0x38] sm:$0xff]  ;;  %99 = vmatpush.bf16.msra.mxu0 %v264_v0  ;;  %v67_v3 = vld [vmem:[#allocation2] sm:$0xff]  ;;  %v271_v4 = vld [vmem:[#allocation7 + $0x30] sm:$0xff] }
  0x10   :  { %176 = vmatpush.bf16.msra.mxu1 %v272_v1  ;;  %v68_v5 = vpack.c.bf16 %v67_v3, %v67_v3  ;;  %v270_v6 = vld [vmem:[#allocation7 + $0x28] sm:$0xff]  ;;  %v269_v7 = vld [vmem:[#allocation7 + $0x20] sm:$0xff]  ;;  %v268_v8 = vld [vmem:[#allocation7 + $0x18] sm:$0xff]  ;;  %v190_v19 = vand.u32 127, %v189_v18 }
  0x11   :  { %v267_v9 = vld [vmem:[#allocation7 + $0x10] sm:$0xff]  ;;  %v266_v10 = vld [vmem:[#allocation7 + $0x8] sm:$0xff]  ;;  %v265_v11 = vld [vmem:[#allocation7] sm:$0xff] }
  0x12   :  { %v279_v12 = vld [vmem:[%s443_s2] ss:$0 sm:$0xff]  ;;  %vm191_vm1 = vcmp.lt.s32.totalorder %v190_v19, 16  ;;  %s392_s2 = smov [#allocation8]  }
  0x13   :  { %100 = vmatpush.bf16.msra.mxu0 %v263_v2  ;;  %v280_v20 = vld [vmem:[%s445_s4] ss:$0 sm:$0xff]  ;;  %s209_s11 = sshll.u32 %s392_s2, 4  ;;  %s211_s4 = sshll.u32 %s446_s5, 4  ;;  %s210_s11 = int_to_ptr.vmem [resolvable:$true] %s209_s11  ;;  %s212_s4 = int_to_ptr.hbm [resolvable:$true] %s211_s4 }
  0x14   :  { %177 = vmatpush.bf16.msra.mxu1 %v271_v4 }
  0x16   :  { %230 = vmatmul.msk.bf16.vlgmr.msra.gmra.mxu0 %vm89_vm0, %v68_v5 }
  0x18   :  { %178 = vmatpush.bf16.msra.mxu1 %v270_v6 }
  0x1c   :  { %179 = vmatpush.bf16.msra.mxu1 %v269_v7 }
  0x20   :  { %180 = vmatpush.bf16.msra.mxu1 %v268_v8 }
  0x24   :  { %181 = vmatpush.bf16.msra.mxu1 %v267_v9 }
  0x28   :  { %182 = vmatpush.bf16.msra.mxu1 %v266_v10 }
  0x2c   :  { %183 = vmatpush.bf16.msra.mxu1 %v265_v11 }
  0x93   :  { %v102_v13 = vpop.f32.mrf.mxu0 }
  0x94   :  { %v103_v14 = vadd.f32 %v279_v12, %v102_v13 }
  0x96   :  { %v106_v15 = vmax.f32 %v103_v14, 0.0 }
  0x98   :  { %v107_v16 = vpack.c.bf16 %v106_v15, %v106_v15 }
  0x9a   :  { %184 = vmatmul.bf16.vlgmr.msra.gmra.mxu1 %v107_v16 }
  0x9b   :  { %v104_v17 = vpop.f32.mrf.mxu0 }
 0x117   :  { %v185_v21 = vpop.f32.mrf.mxu1 }
 0x118   :  { %v186_v22 = vadd.f32 %v280_v20, %v185_v21 }
 0x11a   :  { %v192_v23 = vsel %vm191_vm1, %v186_v22, -1e+30 }
 0x11b   :  { %193 = vmax.xlane.f32.xlu0 %v192_v23 }
 0x11f   :  { %v187_v24 = vpop.f32.mrf.mxu1 }
 0x18e   :  { %v194_v25 = vpop.xlane.xlu0 %193 }
 0x18f   :  { %v195_v26 = vsub.f32 %v192_v23, %v194_v25 }
 0x191   :  { %v196_v27 = vmul.f32 1.442695, %v195_v26 }
 0x193   :  { %281 = vpow2.f32 %v196_v27 }
 0x199   :  { %v282_v28 = vpop.eup %281 }
 0x19a   :  { %198 = vadd.xlane.f32.xlu0 %v282_v28 }
 0x20d   :  { %v199_v29 = vpop.xlane.xlu0 %198 }
 0x20e   :  { %283 = vlog2.f32 %v199_v29 }
 0x214   :  { %v284_v30 = vpop.eup %283 }
 0x215   :  { %v201_v31 = vmul.f32 0.6931472, %v284_v30 }
 0x217   :  { %v202_v32 = vsub.f32 %v195_v26, %v201_v31 }
 0x219   :  { %203 = vst [vmem:[#allocation8] sm:$0xff] %v202_v32 }
 0x21a   :  { %214 = dma.vmem_to_hbm [thread:$0]  %s210_s11, 128, %s212_s4, [#allocation4]  }
 0x21b   :  { %385 = dma.done.wait [#allocation4], 128  }
 0x21c   :  { %386 = vsyncadd [#allocation4], 4294967168 }
 0x21d   :  { %219 = vsyncpa [#allocation3], 1 }
 0x21e   :  { %220 = vsyncpa [#allocation6], 1 }
 0x21f   :  { %221 = vsyncpa [#allocation4], 1 }

</bundles_post_ra>
